<compile_context>
chip_gen: v5e
topology: v5e:2x2
jax: 0.10.0
libtpu: 0.0.40
codegen_flags: <defaults>
</compile_context>

<pallas_src>
import jax
import jax.numpy as jnp
from jax import lax
from jax.experimental import pallas as pl
from jax.experimental.pallas import tpu as pltpu


def _input_layer_kernel(x_ref, b_ref, sb_ref, out_ref):
    # x_ref:   (1, H+2, K)  bf16, whole padded image (one DMA per image), K=Cin*(W+2)
    # b_ref:   (3K, CW)     bf16, fused per-kh block-Toeplitz conv weights, CW=Cout*W
    # sb_ref:  (2, CW)      f32,  row 0 = folded BN scale, row 1 = folded BN bias
    # out_ref: (1, H, CW)   bf16, lane-dense output slab
    h = out_ref.shape[1]
    x = x_ref[0]                                              # (H+2, K) resident

    # Concatenate the three kh row-windows along the lane axis -> (H, 3K) LHS,
    # matching b_ref's kh-major row layout.  Single MXU dot, f32 accumulation.
    lhs = jnp.concatenate([x[0:h, :], x[1:h + 1, :], x[2:h + 2, :]], axis=-1)
    acc = jnp.dot(lhs, b_ref[...], preferred_element_type=jnp.float32)

    # Fused BatchNorm (inference) + ReLU epilogue, once, in f32.
    y = jnp.maximum(acc * sb_ref[0] + sb_ref[1], 0.0)
    out_ref[0] = y.astype(out_ref.dtype)


def _toeplitz_weights(weight_hwio, width):
    """Pack (3,3,Cin,Cout) conv weights into one fused block-Toeplitz matrix.

    B[kh*Cin*(W+2) + ci*(W+2) + p, co*W + w] = weight[kh, p-w, ci, co]
      if 0 <= p-w <= 2 else 0   (structural zeros implement the W halo exactly)
    """
    p = jnp.arange(width + 2)
    w = jnp.arange(width)
    kw = jnp.arange(3)
    sel = (p[None, None, :] == w[None, :, None] + kw[:, None, None]
           ).astype(weight_hwio.dtype)                        # (3, W, W+2)
    b = jnp.einsum("kwp,hkic->hipcw", sel, weight_hwio)       # (3,Cin,W+2,Cout,W)
    cin, cout = weight_hwio.shape[2], weight_hwio.shape[3]
    return b.reshape(3 * cin * (width + 2), cout * width)     # (3K, CW)


def input_layer_forward(x_nchw, weight_hwio, gamma, beta, running_mean,
                        running_var, eps=1e-5, out_dtype=jnp.bfloat16,
                        packed_out=False):
    """Conv3x3(pad=1, no bias) + BatchNorm2d(eval) + ReLU.

    x_nchw:      (N, Cin, H, W)
    weight_hwio: (3, 3, Cin, Cout)
    Returns NCHW (default) or the packed lane-dense (N, H, Cout*W) slab.
    """
    N, Cin, H, W = x_nchw.shape
    Cout = weight_hwio.shape[-1]
    K = Cin * (W + 2)
    CW = Cout * W

    # ---- glue: layout + padding + BN folding + weight packing (plain JAX) ----
    x_pad = jnp.pad(x_nchw, ((0, 0), (0, 0), (1, 1), (1, 1)))  # (N,Cin,H+2,W+2)
    x2d = jnp.transpose(x_pad, (0, 2, 1, 3)).reshape(N, H + 2, K)
    x2d = x2d.astype(jnp.bfloat16)

    b_pack = _toeplitz_weights(weight_hwio.astype(jnp.float32), W)
    b_pack = b_pack.astype(jnp.bfloat16)                       # (3K, CW)

    inv_std = lax.rsqrt(running_var.astype(jnp.float32) + eps)
    scale = (gamma.astype(jnp.float32) * inv_std)              # (Cout,)
    bias = (beta.astype(jnp.float32)
            - running_mean.astype(jnp.float32) * scale)
    sb = jnp.stack([jnp.repeat(scale, W), jnp.repeat(bias, W)])  # (2, CW)

    out2d = pl.pallas_call(
        _input_layer_kernel,
        out_shape=jax.ShapeDtypeStruct((N, H, CW), out_dtype),
        grid_spec=pltpu.PrefetchScalarGridSpec(
            num_scalar_prefetch=0,
            grid=(N,),
            in_specs=[
                pl.BlockSpec((1, H + 2, K), lambda n: (n, 0, 0)),
                pl.BlockSpec((3 * K, CW), lambda n: (0, 0)),
                pl.BlockSpec((2, CW), lambda n: (0, 0)),
            ],
            out_specs=pl.BlockSpec((1, H, CW), lambda n: (n, 0, 0)),
        ),
        compiler_params=pltpu.CompilerParams(
            dimension_semantics=("parallel",),      # >=2 steps for v7x's 2 TCs
            vmem_limit_bytes=32 * 1024 * 1024),
    )(x2d, b_pack, sb)

    if packed_out:
        return out2d                                # (N, H, Cout*W) lane-dense
    out = out2d.reshape(N, H, Cout, W)
    return jnp.transpose(out, (0, 2, 1, 3))         # back to NCHW


def _reference(x_nchw, weight_hwio, gamma, beta, mean, var, eps=1e-5):
    out = lax.conv_general_dilated(
        x_nchw, weight_hwio,
        window_strides=(1, 1), padding=((1, 1), (1, 1)),
        dimension_numbers=("NCHW", "HWIO", "NCHW"),
        preferred_element_type=jnp.float32)
    inv_std = lax.rsqrt(var.astype(jnp.float32) + eps)
    scale = (gamma * inv_std).reshape(1, -1, 1, 1)
    bias = (beta - mean * gamma * inv_std).reshape(1, -1, 1, 1)
    return jnp.maximum(out * scale + bias, 0.0)


if __name__ == "__main__":
    key = jax.random.PRNGKey(0)
    k_x, k_w, k_g, k_b, k_m, k_v = jax.random.split(key, 6)

    N, Cin, H, W, Cout = 2, 4, 16, 16, 32

    x = jax.random.normal(k_x, (N, Cin, H, W), dtype=jnp.float32)
    # Conv weight (HWIO); deterministic synthetic init (no checkpoint load).
    weight = 0.1 * jax.random.normal(k_w, (3, 3, Cin, Cout), dtype=jnp.float32)
    # BatchNorm2d parameters / running stats (inference-mode semantics).
    gamma = 1.0 + 0.05 * jax.random.normal(k_g, (Cout,), dtype=jnp.float32)
    beta = 0.05 * jax.random.normal(k_b, (Cout,), dtype=jnp.float32)
    running_mean = 0.05 * jax.random.normal(k_m, (Cout,), dtype=jnp.float32)
    running_var = jnp.abs(1.0 + 0.05 * jax.random.normal(k_v, (Cout,),
                                                         dtype=jnp.float32))

    out = jax.block_until_ready(
        input_layer_forward(x, weight, gamma, beta, running_mean, running_var))
    assert out.shape == (N, Cout, H, W)
    out_f32 = out.astype(jnp.float32)

    # Check against the identical math (bf16 inputs, f32 accumulation);
    # tolerance covers the bf16 output quantization of the kernel.
    ref_bf16 = _reference(x.astype(jnp.bfloat16), weight.astype(jnp.bfloat16),
                          gamma, beta, running_mean, running_var)
    assert jnp.allclose(out_f32, ref_bf16, atol=1e-2, rtol=1e-2), \
        "mismatch vs bf16-input reference"

    # Loose sanity check against the pure-f32 reference (bf16 quantization).
    ref_f32 = _reference(x, weight, gamma, beta, running_mean, running_var)
    assert jnp.allclose(out_f32, ref_f32, atol=6e-2, rtol=6e-2), \
        "mismatch vs f32 reference"

    print("KERNEL_OK")
</pallas_src>

<mosaic_0001>
module attributes {stable_mosaic.version = 11 : i64} {
  func.func @_input_layer_kernel(%arg0: i32, %arg1: memref<1x18x72xbf16, #tpu.memory_space<vmem>>, %arg2: memref<216x512xbf16, #tpu.memory_space<vmem>>, %arg3: memref<2x512xf32, #tpu.memory_space<vmem>>, %arg4: memref<1x16x512xbf16, #tpu.memory_space<vmem>>) attributes {dimension_semantics = [#tpu.dimension_semantics<parallel>], iteration_bounds = array<i64: 2>, scalar_prefetch = 0 : i64, scratch_operands = 0 : i64, tpu.core_type = #tpu.core_type<tc>, window_params = [{transform_indices = @transform_0, window_bounds = array<i64: 1, 18, 72>}, {pipeline_mode = #tpu.pipeline_mode<synchronous>, transform_indices = @transform_1, window_bounds = array<i64: 216, 512>}, {pipeline_mode = #tpu.pipeline_mode<synchronous>, transform_indices = @transform_2, window_bounds = array<i64: 2, 512>}, {transform_indices = @transform_3, window_bounds = array<i64: 1, 16, 512>}]} {
    %c0 = arith.constant 0 : index
    %c0_0 = arith.constant 0 : index
    %c0_1 = arith.constant 0 : index
    %0 = vector.load %arg1[%c0, %c0_0, %c0_1] : memref<1x18x72xbf16, #tpu.memory_space<vmem>>, vector<1x18x72xbf16>
    %1 = vector.shape_cast %0 : vector<1x18x72xbf16> to vector<18x72xbf16>
    %2 = vector.extract_strided_slice %1 {offsets = [0, 0], sizes = [16, 72], strides = [1, 1]} : vector<18x72xbf16> to vector<16x72xbf16>
    %3 = vector.extract_strided_slice %1 {offsets = [1, 0], sizes = [16, 72], strides = [1, 1]} : vector<18x72xbf16> to vector<16x72xbf16>
    %4 = vector.extract_strided_slice %1 {offsets = [2, 0], sizes = [16, 72], strides = [1, 1]} : vector<18x72xbf16> to vector<16x72xbf16>
    %5 = tpu.concatenate %2, %3, %4 in 1 : vector<16x72xbf16>, vector<16x72xbf16>, vector<16x72xbf16> -> vector<16x216xbf16>
    %c0_2 = arith.constant 0 : index
    %c0_3 = arith.constant 0 : index
    %6 = vector.load %arg2[%c0_2, %c0_3] : memref<216x512xbf16, #tpu.memory_space<vmem>>, vector<216x512xbf16>
    %cst = arith.constant dense<0.000000e+00> : vector<16x512xf32>
    %7 = tpu.matmul %5, %6, %cst {dimension_numbers = #tpu.dot_dimension_numbers<[1], [0], [0], [1], [0, 0, 1, 1], [], []>} : vector<16x216xbf16>, vector<216x512xbf16>, vector<16x512xf32> -> vector<16x512xf32>
    %c0_4 = arith.constant 0 : index
    %c0_5 = arith.constant 0 : index
    %8 = vector.load %arg3[%c0_4, %c0_5] : memref<2x512xf32, #tpu.memory_space<vmem>>, vector<1x512xf32>
    %9 = vector.shape_cast %8 : vector<1x512xf32> to vector<512xf32>
    %10 = vector.shape_cast %9 : vector<512xf32> to vector<1x512xf32>
    %11 = vector.broadcast %10 : vector<1x512xf32> to vector<16x512xf32>
    %12 = arith.mulf %7, %11 : vector<16x512xf32>
    %c1 = arith.constant 1 : index
    %c0_6 = arith.constant 0 : index
    %13 = vector.load %arg3[%c1, %c0_6] : memref<2x512xf32, #tpu.memory_space<vmem>>, vector<1x512xf32>
    %14 = vector.shape_cast %13 : vector<1x512xf32> to vector<512xf32>
    %15 = vector.shape_cast %14 : vector<512xf32> to vector<1x512xf32>
    %16 = vector.broadcast %15 : vector<1x512xf32> to vector<16x512xf32>
    %17 = arith.addf %12, %16 : vector<16x512xf32>
    %cst_7 = arith.constant 0.000000e+00 : f32
    %18 = vector.broadcast %cst_7 : f32 to vector<16x512xf32>
    %19 = arith.maximumf %17, %18 : vector<16x512xf32>
    %20 = arith.truncf %19 : vector<16x512xf32> to vector<16x512xbf16>
    %c0_8 = arith.constant 0 : index
    %c0_9 = arith.constant 0 : index
    %c0_10 = arith.constant 0 : index
    %21 = vector.load %arg4[%c0_8, %c0_9, %c0_10] : memref<1x16x512xbf16, #tpu.memory_space<vmem>>, vector<1x16x512xbf16>
    %22 = vector.shape_cast %21 : vector<1x16x512xbf16> to vector<16x512xbf16>
    %23 = vector.shape_cast %20 : vector<16x512xbf16> to vector<1x16x512xbf16>
    tpu.vector_store %arg4[%c0_8, %c0_9, %c0_10], %23 {strides = array<i32>} : memref<1x16x512xbf16, #tpu.memory_space<vmem>>, vector<1x16x512xbf16>,
    return
  }
  func.func @transform_0(%arg0: i32) -> (i32, i32, i32) {
    %c0_i32 = arith.constant 0 : i32
    %c0_i32_0 = arith.constant 0 : i32
    %c0_i32_1 = arith.constant 0 : i32
    return %arg0, %c0_i32, %c0_i32_0 : i32, i32, i32
  }
  func.func @transform_1(%arg0: i32) -> (i32, i32) {
    %c0_i32 = arith.constant 0 : i32
    %c0_i32_0 = arith.constant 0 : i32
    %c0_i32_1 = arith.constant 0 : i32
    return %c0_i32, %c0_i32_0 : i32, i32
  }
  func.func @transform_2(%arg0: i32) -> (i32, i32) {
    %c0_i32 = arith.constant 0 : i32
    %c0_i32_0 = arith.constant 0 : i32
    %c0_i32_1 = arith.constant 0 : i32
    return %c0_i32, %c0_i32_0 : i32, i32
  }
  func.func @transform_3(%arg0: i32) -> (i32, i32, i32) {
    %c0_i32 = arith.constant 0 : i32
    %c0_i32_0 = arith.constant 0 : i32
    %c0_i32_1 = arith.constant 0 : i32
    return %arg0, %c0_i32, %c0_i32_0 : i32, i32, i32
  }
}

</mosaic_0001>

<bundles_post_ra>
// kernel: tpu_custom_call.1
= control target key start
LH: loop header
LB: loop body
LE: loop exit
PB: predicated region body
PF: predicated region fallthrough
CT: control target
= control target key end

     0   :  { %8 = vsyncpa [#allocation3], 0  ;;  %s1419_s0 = inlined_call_operand.vmem [shape: bf16[2,18,72], index: 0, kind: input, shape index: {}]   ;;  %s1420_s1 = inlined_call_operand.hbm [shape: bf16[216,512], index: 1, kind: input, shape index: {}]   ;;  %s1421_s2 = inlined_call_operand.vmem [shape: f32[2,512], index: 2, kind: input, shape index: {}]   ;;  %s1422_s3 = inlined_call_operand.hbm [shape: bf16[2,16,512], index: 3, kind: output, shape index: {}]  }
   0x1   :  { %9 = vsyncpa [#allocation4], 0 }
   0x2   :  { %11 = vsyncpa [#allocation4 + $0x1], 0  ;;  %s1285_s12 = smov 0   ;;  %s1287_s13 = smov 0  }
   0x3   :  { %s1289_s14 = smov 0   ;;  %s1291_s15 = smov 0  }
   0x4 LB: > { %s1306_s16 = sadd.s32 4294967295, %s1257_s15   ;;  %s821_s17 = sadd.s32 4294967294, %s1257_s15   ;;  %s1257_s15 = sphi %s1291_s15, %s1428_s15   ;;  %s1253_s14 = sphi %s1289_s14, %s1427_s14   ;;  %s1249_s13 = sphi %s1287_s13, %s1426_s13   ;;  %s1245_s12 = sphi %s1285_s12, %s1425_s12  }
   0x5   : > { %s1310_s18 = sadd.s32 1, %s1257_s15   ;;  %s92_s19 = sadd.s32 1, %s1253_s14 }
   0x6   : > { %s89_s20 = ssub.s32 %s1257_s15, %s1310_s18  ;;  %p102_p0 = scmp.ne.s32.totalorder %s1253_s14, %s1249_s13 }
   0x7   : > { %p90_p1 = scmp.eq.s32.totalorder %s89_s20, 0  ;;  %p103_p2 = scmp.eq.s32.totalorder %s1306_s16, 1 }
   0x8   : > { %p108_p3 = scmp.ne.s32.totalorder %s1249_s13, %s1245_s12  ;;  %p109_p4 = scmp.eq.s32.totalorder %s821_s17, 1 }
   0x9   : > { %s1321_s21 = scalar_select %p90_p1, %s1253_s14, %s92_s19  }
   0xa   : > { %p1323_p5 = por %p103_p2, %p102_p0  ;;  %p1327_p6 = por %p109_p4, %p108_p3 }
   0xb   : > { %p822_p7 = scmp.ge.s32.totalorder %s1257_s15, 1  ;;  %p116_p8 = scmp.lt.s32.totalorder %s1257_s15, 3 }
   0xc   : > { %p1120_p9 = scmp.eq.s32.totalorder %s1306_s16, 0  ;;  %s127_s26 = sshll.u32 %s1420_s1, 4  ;;  %s128_s26 = int_to_ptr.hbm [resolvable:$true] %s127_s26 }
   0xd   : > { %p117_p10 = pnand %p822_p7, %p116_p8  ;;  %s1259_s27 = smov [#allocation2]  }
   0xe   : > { %s129_s28 = sshll.u32 %s1259_s27, 4  ;;  %s1260_s29 = smov 256   ;;  %s130_s28 = int_to_ptr.vmem [resolvable:$true] %s129_s28 }
   0xf   : > { %p1112_p11 = pneg %p117_p10  ;;  %s1261_s30 = smov 16  }
  0x10   : > { %156 = sbr.rel (%p117_p10) target bundleno = 333 (0x14d), region = 32 }
  0x11   : > { %p1113_p12 = pnand %p1120_p9, %p1112_p11 }
  0x13   : > { %1115 = dma.hbm_to_vmem [thread:$0]  (!%p1113_p12), %s128_s26, 6912, %s130_s28, [#allocation3], %s1260_s29, %s1260_s29, %s1261_s30  }
  0x15   : > { %1236 = dma.done.wait (%p1120_p9), [#allocation3], 6912  }
  0x16   : > { %1238 = vsyncadd (%p1120_p9), [#allocation3], 4294960384  ;;  %p181_p13 = scmp.lt.s32.totalorder %s1306_s16, 1  ;;  %v947_v2 = vld [vmem:[#allocation2 + $0xe0] sm:$0xf]  ;;  %vm553_vm0 = vcmask 1043456  }
  0x17   : > { %v1082_v4 = vld [vmem:[#allocation2 + $0xec] sm:$0xf0]  ;;  %v931_v5 = vld [vmem:[#allocation2 + $0xc0] sm:$0xf]  ;;  %v1080_v12 = vld [vmem:[#allocation2 + $0xe4] sm:$0xf] }
  0x18   : > { %s182_s4 = scalar_select %p181_p13, %s1306_s16, 1  ;;  %v1078_v6 = vld [vmem:[#allocation2 + $0xcc] sm:$0xf0]  ;;  %v948_v9 = vor.u32 %v1082_v4, %v947_v2  ;;  %v278_v10 = vld [vmem:[#allocation2 + $0x1a0] sm:$0xff]  ;;  %v949_v13 = vld [vmem:[#allocation2 + $0xf0] sm:$0xf0] }
  0x19   : > { %v438_v14 = vunpack.c.l.b16 %v278_v10  ;;  %v439_v15 = vunpack.c.h.b16 %v278_v10  ;;  %v932_v17 = vor.u32 %v1078_v6, %v931_v5  ;;  %v915_v18 = vld [vmem:[#allocation2 + $0xa0] sm:$0xf]  ;;  %v1074_v19 = vld [vmem:[#allocation2 + $0xac] sm:$0xf0]  ;;  %v952_v20 = vor.u32 %v1080_v12, %v949_v13  ;;  %v1076_v22 = vld [vmem:[#allocation2 + $0xc4] sm:$0xf] }
  0x1a   : > { %s1105_s5 = smul.u32 12, %s182_s4  ;;  %566 = vmatpush.bf16.msra.mxu0 %v948_v9  ;;  %v933_v23 = vld [vmem:[#allocation2 + $0xd0] sm:$0xf0]  ;;  %vm198_vm1 = vsmask.f32 7424  ;;  %v916_v32 = vor.u32 %v1074_v19, %v915_v18  ;;  %s1262_s9 = smov 72  }
  0x1b   : > { %v494_v24 = vpack.c.b16 %v438_v14, %v438_v14  ;;  %594 = vmatpush.bf16.msra.mxu2 %v952_v20  ;;  %v936_v26 = vor.u32 %v1076_v22, %v933_v23  ;;  %v1072_v29 = vld [vmem:[#allocation2 + $0xa4] sm:$0xf]  ;;  %v917_v30 = vld [vmem:[#allocation2 + $0xb0] sm:$0xf0]  ;;  %v495_v31 = vpack.c.b16 %v439_v15, %v439_v15  ;;  %v1027_v33 = vld [vmem:[#allocation2 + $0x180] sm:$0xf] }
  0x1c   : > { %s185_s8 = scalar_lea.vmem %s1419_s0, %s1105_s5  ;;  %v1102_v34 = vld [vmem:[#allocation2 + $0x18c] sm:$0xf0]  ;;  %v899_v36 = vld [vmem:[#allocation2 + $0x80] sm:$0xf]  ;;  %v920_v40 = vor.u32 %v1072_v29, %v917_v30  ;;  %v1068_v44 = vld [vmem:[#allocation2 + $0x84] sm:$0xf] }
  0x1d   : > { %v1348_v0 = vld [vmem:[%s185_s8] sm:$0xff]  ;;  %v189_v1 = vld [vmem:[%s185_s8 + $0x8] sm:$0x1]  ;;  %v555_v28 = vsel %vm553_vm0, %v494_v24, 0  ;;  %v1070_v37 = vld [vmem:[#allocation2 + $0x8c] sm:$0xf0]  ;;  %v1028_v38 = vor.u32 %v1102_v34, %v1027_v33 }
  0x1e   : > { %v196_v3 = vunpack.c.l.b16 %v189_v1  ;;  %v200_v7 = vshrl.u32 %v1348_v0, 16  ;;  %v202_v8 = vshll.u32 %v1348_v0, 16  ;;  %567 = vmatpush.bf16.msra.mxu0 %v932_v17  ;;  %582 = vmatpush.bf16.msra.mxu1 %v555_v28  ;;  %v214_v39 = vrot.slane %v1348_v0, 1  ;;  %v1011_v41 = vld [vmem:[#allocation2 + $0x160] sm:$0xf]  ;;  %s1263_s10 = smov 16  }
  0x1f   : > { %595 = vmatpush.bf16.msra.mxu2 %v936_v26  ;;  %v1098_v42 = vld [vmem:[#allocation2 + $0x16c] sm:$0xf0]  ;;  %v901_v45 = vld [vmem:[#allocation2 + $0x90] sm:$0xf0]  ;;  %v558_v46 = vsel %vm553_vm0, %v495_v31, 0  ;;  %vm213_vm2 = vcmask 1046528   ;;  %v900_v47 = vor.u32 %v1070_v37, %v899_v36 }
  0x20   : > { %v197_v11 = vpack.c.b16 %v196_v3, %v196_v3  ;;  %v204_v16 = vrot.slane %v202_v8, 1  ;;  %v883_v48 = vld [vmem:[#allocation2 + $0x60] sm:$0xf]  ;;  %v1012_v49 = vor.u32 %v1098_v42, %v1011_v41  ;;  %v1066_v50 = vld [vmem:[#allocation2 + $0x6c] sm:$0xf0]  ;;  %610 = vmatpush.bf16.msra.mxu3 %v558_v46  ;;  %v904_v53 = vor.u32 %v1068_v44, %v901_v45  ;;  %v1356_v15 = vld [vmem:[#allocation2 + $0x1a8] sm:$0xff] }
  0x21   : > { %v995_v51 = vld [vmem:[#allocation2 + $0x140] sm:$0xf]  ;;  %v1094_v52 = vld [vmem:[#allocation2 + $0x14c] sm:$0xf0]  ;;  %v1100_v54 = vld [vmem:[#allocation2 + $0x184] sm:$0xf]  ;;  %v884_v60 = vor.u32 %v1066_v50, %v883_v48  ;;  %v441_v28 = vunpack.c.h.b16 %v1356_v15 }
  0x22   : > { %v207_v21 = vshll.u32 %v197_v11, 16  ;;  %v205_v25 = vor.u32 %v204_v16, %v200_v7  ;;  %v215_v43 = vrot.slane %v197_v11, 1  ;;  %568 = vmatpush.bf16.msra.mxu0 %v916_v32  ;;  %583 = vmatpush.bf16.msra.mxu1 %v1028_v38  ;;  %v1029_v55 = vld [vmem:[#allocation2 + $0x190] sm:$0xf0]  ;;  %v1064_v57 = vld [vmem:[#allocation2 + $0x64] sm:$0xf]  ;;  %v996_v63 = vor.u32 %v1094_v52, %v995_v51 }
  0x23   : > { %596 = vmatpush.bf16.msra.mxu2 %v920_v40  ;;  %v885_v58 = vld [vmem:[#allocation2 + $0x70] sm:$0xf0]  ;;  %v1032_v59 = vor.u32 %v1100_v54, %v1029_v55  ;;  %v867_v61 = vld [vmem:[#allocation2 + $0x40] sm:$0xf]  ;;  %v1062_v62 = vld [vmem:[#allocation2 + $0x4c] sm:$0xf0]  ;;  %v497_v41 = vpack.c.b16 %v441_v28, %v441_v28 }
  0x24   : > { %v209_v27 = vrot.slane %v207_v21, 1  ;;  %v216_v56 = vsel %vm213_vm2, %v214_v39, %v215_v43  ;;  %v1096_v1 = vld [vmem:[#allocation2 + $0x164] sm:$0xf]  ;;  %v979_v2 = vld [vmem:[#allocation2 + $0x120] sm:$0xf]  ;;  %v888_v5 = vor.u32 %v1064_v57, %v885_v58  ;;  %v868_v11 = vor.u32 %v1062_v62, %v867_v61  ;;  %s178_s24 = sand.u32 1, %s1249_s13  }
  0x25   : > { %611 = vmatpush.bf16.msra.mxu3 %v1032_v59  ;;  %v1090_v3 = vld [vmem:[#allocation2 + $0x12c] sm:$0xf0]  ;;  %v1013_v4 = vld [vmem:[#allocation2 + $0x170] sm:$0xf0]  ;;  %v1060_v6 = vld [vmem:[#allocation2 + $0x44] sm:$0xf]  ;;  %v440_v58 = vunpack.c.l.b16 %v1356_v15 }
  0x26   : > { %v210_v35 = vsel %vm198_vm1, %v205_v25, %v209_v27  ;;  %569 = vmatpush.bf16.msra.mxu0 %v900_v47  ;;  %584 = vmatpush.bf16.msra.mxu1 %v1012_v49  ;;  %v1016_v7 = vor.u32 %v1096_v1, %v1013_v4  ;;  %v869_v8 = vld [vmem:[#allocation2 + $0x50] sm:$0xf0]  ;;  %v1092_v9 = vld [vmem:[#allocation2 + $0x144] sm:$0xf]  ;;  %v851_v12 = vld [vmem:[#allocation2 + $0x20] sm:$0xf]  ;;  %v980_v14 = vor.u32 %v1090_v3, %v979_v2 }
  0x27   : > { %211 = vrot.lane.b32.xlu0 %v210_v35, %s1262_s9  ;;  %597 = vmatpush.bf16.msra.mxu2 %v904_v53  ;;  %v997_v10 = vld [vmem:[#allocation2 + $0x150] sm:$0xf0]  ;;  %v1058_v13 = vld [vmem:[#allocation2 + $0x2c] sm:$0xf0]  ;;  %v963_v16 = vld [vmem:[#allocation2 + $0x100] sm:$0xf]  ;;  %v872_v20 = vor.u32 %v1060_v6, %v869_v8  ;;  %v496_v1 = vpack.c.b16 %v440_v58, %v440_v58 }
  0x28   : > { %v1086_v17 = vld [vmem:[#allocation2 + $0x10c] sm:$0xf0]  ;;  %v1000_v18 = vor.u32 %v1092_v9, %v997_v10  ;;  %v955_v19 = vld [vmem:[#allocation2 + $0xe8] sm:$0xf]  ;;  %v1083_v21 = vld [vmem:[#allocation2 + $0xf4] sm:$0xf0]  ;;  %v852_v26 = vor.u32 %v1058_v13, %v851_v12 }
  0x29   : > { %612 = vmatpush.bf16.msra.mxu3 %v1016_v7  ;;  %v1088_v22 = vld [vmem:[#allocation2 + $0x124] sm:$0xf]  ;;  %v981_v23 = vld [vmem:[#allocation2 + $0x130] sm:$0xf0]  ;;  %v964_v27 = vor.u32 %v1086_v17, %v963_v16  ;;  %v835_v29 = vld [vmem:[#allocation2] sm:$0xf]  ;;  %v956_v32 = vor.u32 %v1083_v21, %v955_v19 }
  0x2a   : > { %570 = vmatpush.bf16.msra.mxu0 %v884_v60  ;;  %585 = vmatpush.bf16.msra.mxu1 %v996_v63  ;;  %v1056_v24 = vld [vmem:[#allocation2 + $0x24] sm:$0xf]  ;;  %v853_v25 = vld [vmem:[#allocation2 + $0x30] sm:$0xf0]  ;;  %v1054_v30 = vld [vmem:[#allocation2 + $0xc] sm:$0xf0]  ;;  %v984_v33 = vor.u32 %v1088_v22, %v981_v23 }
  0x2b   : > { %598 = vmatpush.bf16.msra.mxu2 %v888_v5  ;;  %v1081_v31 = vld [vmem:[#allocation2 + $0xec] sm:$0xf]  ;;  %v957_v34 = vld [vmem:[#allocation2 + $0xf8] sm:$0xf0]  ;;  %v856_v35 = vor.u32 %v1056_v24, %v853_v25  ;;  %v939_v36 = vld [vmem:[#allocation2 + $0xc8] sm:$0xf]  ;;  %v836_v40 = vor.u32 %v1054_v30, %v835_v29 }
  0x2c   : > { %v1079_v37 = vld [vmem:[#allocation2 + $0xd4] sm:$0xf0]  ;;  %v1052_v38 = vld [vmem:[#allocation2 + $0x4] sm:$0xf]  ;;  %v837_v39 = vld [vmem:[#allocation2 + $0x10] sm:$0xf0]  ;;  %v960_v42 = vor.u32 %v1081_v31, %v957_v34 }
  0x2d   : > { %613 = vmatpush.bf16.msra.mxu3 %v1000_v18  ;;  %v940_v43 = vor.u32 %v1079_v37, %v939_v36  ;;  %v1077_v44 = vld [vmem:[#allocation2 + $0xcc] sm:$0xf]  ;;  %v941_v45 = vld [vmem:[#allocation2 + $0xd8] sm:$0xf0]  ;;  %v840_v46 = vor.u32 %v1052_v38, %v837_v39  ;;  %v564_v47 = vsel %vm553_vm0, %v497_v41, 0  ;;  %v561_v7 = vsel %vm553_vm0, %v496_v1, 0 }
  0x2e   : > { %571 = vmatpush.bf16.msra.mxu0 %v868_v11  ;;  %586 = vmatpush.bf16.msra.mxu1 %v980_v14  ;;  %v1101_v48 = vld [vmem:[#allocation2 + $0x18c] sm:$0xf]  ;;  %v1037_v49 = vld [vmem:[#allocation2 + $0x198] sm:$0xf0]  ;;  %v944_v50 = vor.u32 %v1077_v44, %v941_v45  ;;  %v1084_v59 = vld [vmem:[#allocation2 + $0x104] sm:$0xf] }
  0x2f   : > { %217 = vrot.lane.b32.xlu0 %v216_v56, %s1263_s10  ;;  %599 = vmatpush.bf16.msra.mxu2 %v872_v20  ;;  %v1073_v51 = vld [vmem:[#allocation2 + $0xac] sm:$0xf]  ;;  %v925_v52 = vld [vmem:[#allocation2 + $0xb8] sm:$0xf0]  ;;  %v1040_v53 = vor.u32 %v1101_v48, %v1037_v49  ;;  %v965_v60 = vld [vmem:[#allocation2 + $0x110] sm:$0xf0] }
  0x30   : > { %v928_v54 = vor.u32 %v1073_v51, %v925_v52  ;;  %v1069_v55 = vld [vmem:[#allocation2 + $0x8c] sm:$0xf]  ;;  %v909_v56 = vld [vmem:[#allocation2 + $0x98] sm:$0xf0]  ;;  %v968_v61 = vor.u32 %v1084_v59, %v965_v60  ;;  %v923_v62 = vld [vmem:[#allocation2 + $0xa8] sm:$0xf] }
  0x31   : > { %614 = vmatpush.bf16.msra.mxu3 %v984_v33  ;;  %v912_v57 = vor.u32 %v1069_v55, %v909_v56  ;;  %v1075_v63 = vld [vmem:[#allocation2 + $0xb4] sm:$0xf0]  ;;  %v1065_v2 = vld [vmem:[#allocation2 + $0x6c] sm:$0xf]  ;;  %v893_v4 = vld [vmem:[#allocation2 + $0x78] sm:$0xf0] }
  0x32   : > { %572 = vmatpush.bf16.msra.mxu0 %v852_v26  ;;  %587 = vmatpush.bf16.msra.mxu1 %v964_v27  ;;  %v924_v3 = vor.u32 %v1075_v63, %v923_v62  ;;  %v1097_v5 = vld [vmem:[#allocation2 + $0x16c] sm:$0xf]  ;;  %v1021_v6 = vld [vmem:[#allocation2 + $0x178] sm:$0xf0]  ;;  %v896_v8 = vor.u32 %v1065_v2, %v893_v4  ;;  %v907_v10 = vld [vmem:[#allocation2 + $0x88] sm:$0xf] }
  0x33   : > { %600 = vmatpush.bf16.msra.mxu2 %v856_v35  ;;  %v1024_v9 = vor.u32 %v1097_v5, %v1021_v6  ;;  %v1071_v11 = vld [vmem:[#allocation2 + $0x94] sm:$0xf0]  ;;  %v1035_v13 = vld [vmem:[#allocation2 + $0x188] sm:$0xf]  ;;  %v1061_v15 = vld [vmem:[#allocation2 + $0x4c] sm:$0xf] }
  0x34   : > { %v908_v12 = vor.u32 %v1071_v11, %v907_v10  ;;  %v1103_v14 = vld [vmem:[#allocation2 + $0x194] sm:$0xf0]  ;;  %v877_v17 = vld [vmem:[#allocation2 + $0x58] sm:$0xf0]  ;;  %v1093_v18 = vld [vmem:[#allocation2 + $0x14c] sm:$0xf] }
  0x35   : > { %615 = vmatpush.bf16.msra.mxu3 %v968_v61  ;;  %v1036_v16 = vor.u32 %v1103_v14, %v1035_v13  ;;  %v1005_v19 = vld [vmem:[#allocation2 + $0x158] sm:$0xf0]  ;;  %v880_v20 = vor.u32 %v1061_v15, %v877_v17  ;;  %v891_v22 = vld [vmem:[#allocation2 + $0x68] sm:$0xf]  ;;  %v1067_v23 = vld [vmem:[#allocation2 + $0x74] sm:$0xf0] }
  0x36   : > { %622 = vmatpush.bf16.msrb.mxu1 %v956_v32  ;;  %573 = vmatpush.bf16.msra.mxu0 %v836_v40  ;;  %v1008_v21 = vor.u32 %v1093_v18, %v1005_v19  ;;  %v1019_v24 = vld [vmem:[#allocation2 + $0x168] sm:$0xf]  ;;  %v892_v25 = vor.u32 %v1067_v23, %v891_v22  ;;  %v1099_v26 = vld [vmem:[#allocation2 + $0x174] sm:$0xf0]  ;;  %v1057_v27 = vld [vmem:[#allocation2 + $0x2c] sm:$0xf] }
  0x37   : > { %601 = vmatpush.bf16.msra.mxu2 %v840_v46  ;;  %v1020_v28 = vor.u32 %v1099_v26, %v1019_v24  ;;  %v861_v29 = vld [vmem:[#allocation2 + $0x38] sm:$0xf0]  ;;  %v1089_v30 = vld [vmem:[#allocation2 + $0x12c] sm:$0xf]  ;;  %v875_v34 = vld [vmem:[#allocation2 + $0x48] sm:$0xf] }
  0x38   : > { %v989_v31 = vld [vmem:[#allocation2 + $0x138] sm:$0xf0]  ;;  %v864_v32 = vor.u32 %v1057_v27, %v861_v29  ;;  %v1063_v35 = vld [vmem:[#allocation2 + $0x54] sm:$0xf0]  ;;  %v1003_v36 = vld [vmem:[#allocation2 + $0x148] sm:$0xf] }
  0x39   : > { %638 = vmatpush.bf16.msrb.mxu3 %v561_v7  ;;  %v992_v33 = vor.u32 %v1089_v30, %v989_v31  ;;  %v876_v37 = vor.u32 %v1063_v35, %v875_v34  ;;  %v1095_v38 = vld [vmem:[#allocation2 + $0x154] sm:$0xf0]  ;;  %v1053_v39 = vld [vmem:[#allocation2 + $0xc] sm:$0xf]  ;;  %v845_v40 = vld [vmem:[#allocation2 + $0x18] sm:$0xf0] }
  0x3a   : > { %650 = vmatpush.bf16.msrb.mxu0 %v960_v42  ;;  %623 = vmatpush.bf16.msrb.mxu1 %v940_v43  ;;  %v1004_v41 = vor.u32 %v1095_v38, %v1003_v36  ;;  %v848_v42 = vor.u32 %v1053_v39, %v845_v40  ;;  %v1085_v43 = vld [vmem:[#allocation2 + $0x10c] sm:$0xf]  ;;  %v973_v44 = vld [vmem:[#allocation2 + $0x118] sm:$0xf0]  ;;  %v859_v46 = vld [vmem:[#allocation2 + $0x28] sm:$0xf] }
  0x3b   : > { %666 = vmatpush.bf16.msrb.mxu2 %v564_v47  ;;  %v976_v45 = vor.u32 %v1085_v43, %v973_v44  ;;  %v1059_v47 = vld [vmem:[#allocation2 + $0x34] sm:$0xf0]  ;;  %v987_v48 = vld [vmem:[#allocation2 + $0x128] sm:$0xf]  ;;  %vm219_vm3 = vcmask 588800   ;;  %vm223_vm4 = vcmask 130048  }
  0x3c   : > { %v860_v49 = vor.u32 %v1059_v47, %v859_v46  ;;  %v843_v52 = vld [vmem:[#allocation2 + $0x8] sm:$0xf]  ;;  %v1087_v56 = vld [vmem:[#allocation2 + $0x114] sm:$0xf0]  ;;  %vm550_vm5 = vcmask 719872   ;;  %s827_s25 = sshll.u32 %s178_s24, 5 }
  0x3d   : > { %639 = vmatpush.bf16.msrb.mxu3 %v1036_v16  ;;  %v1366_v1 = vld [vmem:[%s1421_s2] ss:$2 sm:$0xf]  ;;  %v1045_v4 = vld [vmem:[%s1421_s2 + $0x1] ss:$2 sm:$0xf] }
  0x3e   : > { %651 = vmatpush.bf16.msrb.mxu0 %v944_v50  ;;  %624 = vmatpush.bf16.msrb.mxu1 %v924_v3  ;;  %v1091_v50 = vld [vmem:[#allocation2 + $0x134] sm:$0xf0]  ;;  %v680_v3 = vperm.slane %v1366_v1, 0  ;;  %v699_v7 = vperm.slane %v1045_v4, 0  ;;  %s1376_s26 = scalar_lea.vmem [#allocation5], %s827_s25  ;;  %v683_v29 = vperm.slane %v1366_v1, 3 }
  0x3f   : > { %667 = vmatpush.bf16.msrb.mxu2 %v1040_v53  ;;  %v988_v51 = vor.u32 %v1091_v50, %v987_v48  ;;  %v1055_v53 = vld [vmem:[#allocation2 + $0x14] sm:$0xf0]  ;;  %v702_v31 = vperm.slane %v1045_v4, 3  ;;  %v682_v36 = vperm.slane %v1366_v1, 2  ;;  %s1104_s27 = sshll.u32 %s1306_s16, 5  ;;  %s744_s4 = sshll.u32 %s1376_s26, 4  ;;  %s745_s4 = int_to_ptr.vmem [resolvable:$true] %s744_s4 }
  0x40   : > { %v844_v55 = vor.u32 %v1055_v53, %v843_v52  ;;  %s743_s30 = scalar_lea.hbm %s1422_s3, %s1104_s27  ;;  %s732_s16 = scalar_lea.sflag [#allocation4], %s178_s24 }
  0x41   : > { %640 = vmatpush.bf16.msrb.mxu3 %v1020_v28  ;;  %s746_s5 = sshll.u32 %s743_s30, 4  ;;  %s1211_s11 = scalar_lea.hbm %s1422_s3, 64  ;;  %s747_s5 = int_to_ptr.hbm [resolvable:$true] %s746_s5 }
  0x42   : > { %652 = vmatpush.bf16.msrb.mxu0 %v928_v54  ;;  %625 = vmatpush.bf16.msrb.mxu1 %v908_v12  ;;  %v971_v54 = vld [vmem:[#allocation2 + $0x108] sm:$0xf]  ;;  %v700_v12 = vperm.slane %v1045_v4, 1  ;;  %s1205_s6 = sshra.s32 %s747_s5, 4  ;;  %s1206_s6 = int_to_ptr.hbm [resolvable:$true] %s1205_s6 }
  0x43   : > { %668 = vmatpush.bf16.msrb.mxu2 %v1024_v9  ;;  %s1207_s7 = scalar_lea.hbm %s1206_s6, 32  ;;  %p1212_p3 = scmp.lt.s32.totalorder %s1206_s6, %s1422_s3 }
  0x44   : > { %p1208_p0 = scmp.ne.s32.totalorder %s1206_s6, %s1207_s7  ;;  %p1213_p4 = scmp.lt.s32.totalorder %s1211_s11, %s1207_s7 }
  0x45   : > { %641 = vmatpush.bf16.msrb.mxu3 %v1004_v41  ;;  %v701_v41 = vperm.slane %v1045_v4, 2 }
  0x46   : > { %653 = vmatpush.bf16.msrb.mxu0 %v912_v57  ;;  %626 = vmatpush.bf16.msrb.mxu1 %v892_v25  ;;  %v972_v57 = vor.u32 %v1087_v56, %v971_v54  ;;  %p1209_p1 = pnand %p1208_p0, %p1323_p5  ;;  %p1214_p7 = por %p1213_p4, %p1212_p3 }
  0x47   : > { %669 = vmatpush.bf16.msrb.mxu2 %v1008_v21 }
  0x48   : > { %p1210_p2 = pneg %p1209_p1 }
  0x49   : > { %642 = vmatpush.bf16.msrb.mxu3 %v988_v51 }
  0x4a   : > { %654 = vmatpush.bf16.msrb.mxu0 %v896_v8  ;;  %627 = vmatpush.bf16.msrb.mxu1 %v876_v37  ;;  %v681_v8 = vperm.slane %v1366_v1, 1  ;;  %p1215_p8 = pnand %p1214_p7, %p1210_p2 }
  0x4b   : > { %670 = vmatpush.bf16.msrb.mxu2 %v992_v33 }
  0x4d   : > { %643 = vmatpush.bf16.msrb.mxu3 %v972_v57 }
  0x4e   : > { %655 = vmatpush.bf16.msrb.mxu0 %v880_v20  ;;  %628 = vmatpush.bf16.msrb.mxu1 %v860_v49 }
  0x4f   : > { %671 = vmatpush.bf16.msrb.mxu2 %v976_v45 }
  0x52   : > { %656 = vmatpush.bf16.msrb.mxu0 %v864_v32  ;;  %629 = vmatpush.bf16.msrb.mxu1 %v844_v55 }
  0x56   : > { %657 = vmatpush.bf16.msrb.mxu0 %v848_v42 }
  0x99   : > { %v212_v58 = vpop.permute.xlu0 %211 }
  0x9a   : > { %v221_v59 = vsel %vm219_vm3, %v1348_v0, %v212_v58 }
  0x9b   : > { %574 = vmatmul.bf16.vlgmr.msra.gmra.mxu0 %v221_v59  ;;  %602 = vmatmul.bf16.vlgmr.msra.gmra.mxu2 %v221_v59 }
  0xa1   : > { %v218_v60 = vpop.permute.xlu0 %217 }
  0xa2   : > { %v225_v61 = vsel %vm223_vm4, %v212_v58, %v218_v60 }
  0xa3   : > { %1041 = vmatmul.msk.bf16.vlgmr.msra.gmra.mxu1 %vm550_vm5, %v225_v61  ;;  %1042 = vmatmul.msk.bf16.vlgmr.msra.gmra.mxu3 %vm550_vm5, %v225_v61 }
  0xab   : > { %658 = vmatmul.bf16.vlgmr.msrb.gmra.mxu0 %v221_v59  ;;  %1044 = vmatmul.msk.bf16.vlgmr.msrb.gmra.mxu2 %vm550_vm5, %v225_v61 }
  0xb3   : > { %630 = vmatmul.bf16.vlgmr.msrb.gmra.mxu1 %v221_v59  ;;  %1043 = vmatmul.msk.bf16.vlgmr.msrb.gmra.mxu3 %vm550_vm5, %v225_v61 }
 0x118   : > { %v575_v62 = vpop.f32.mrf.mxu0 }
 0x11e   : > { %v603_v63 = vpop.f32.mrf.mxu2 }
 0x120   : > { %v589_v0 = vpop.f32.mrf.mxu1  ;;  %v577_v5 = vpop.f32.mrf.mxu0 }
 0x121   : > { %v590_v2 = vadd.f32 %v589_v0, %v575_v62 }
 0x123   : > { %v688_v6 = vmul.f32 %v680_v3, %v590_v2 }
 0x125   : > { %v707_v14 = vadd.f32 %v699_v7, %v688_v6 }
 0x126   : > { %v605_v9 = vpop.f32.mrf.mxu2  ;;  %v617_v10 = vpop.f32.mrf.mxu3 }
 0x127   : > { %v618_v11 = vadd.f32 %v617_v10, %v603_v63  ;;  %v715_v18 = vmax.f32 %v707_v14, 0.0 }
 0x128   : > { %v591_v13 = vpop.f32.mrf.mxu1  ;;  %v659_v21 = vpop.f32.mrf.mxu0 }
 0x129   : > { %v689_v15 = vmul.f32 %v681_v8, %v618_v11  ;;  %v592_v16 = vadd.f32 %v591_v13, %v577_v5 }
 0x12b   : > { %v708_v17 = vadd.f32 %v700_v12, %v689_v15  ;;  %v692_v20 = vmul.f32 %v680_v3, %v592_v16 }
 0x12d   : > { %v716_v19 = vmax.f32 %v708_v17, 0.0  ;;  %v711_v26 = vadd.f32 %v699_v7, %v692_v20 }
 0x12e   : > { %v619_v22 = vpop.f32.mrf.mxu3  ;;  %v673_v23 = vpop.f32.mrf.mxu2 }
 0x12f   : > { %v723_v24 = vpack.c.bf16 %v716_v19, %v715_v18  ;;  %v620_v25 = vadd.f32 %v619_v22, %v605_v9  ;;  %v674_v28 = vadd.f32 %v673_v23, %v659_v21  ;;  %v719_v33 = vmax.f32 %v711_v26, 0.0 }
 0x130   : > { %v631_v32 = vpop.f32.mrf.mxu1  ;;  %v661_v42 = vpop.f32.mrf.mxu0 }
 0x131   : > { %727 = vst [vmem:[%s1376_s26] sm:$0xff] %v723_v24  ;;  %v693_v27 = vmul.f32 %v681_v8, %v620_v25  ;;  %v691_v35 = vmul.f32 %v683_v29, %v674_v28 }
 0x133   : > { %v712_v30 = vadd.f32 %v700_v12, %v693_v27  ;;  %v710_v43 = vadd.f32 %v702_v31, %v691_v35 }
 0x135   : > { %v720_v34 = vmax.f32 %v712_v30, 0.0  ;;  %v718_v47 = vmax.f32 %v710_v43, 0.0 }
 0x136   : > { %v645_v37 = vpop.f32.mrf.mxu3  ;;  %v675_v38 = vpop.f32.mrf.mxu2 }
 0x137   : > { %v725_v39 = vpack.c.bf16 %v720_v34, %v719_v33  ;;  %v646_v40 = vadd.f32 %v645_v37, %v631_v32  ;;  %v676_v45 = vadd.f32 %v675_v38, %v661_v42 }
 0x138   : > { %v633_v50 = vpop.f32.mrf.mxu1 }
 0x139   : > { %729 = vst [vmem:[%s1376_s26 + $0x10] sm:$0xff] %v725_v39  ;;  %v690_v44 = vmul.f32 %v682_v36, %v646_v40  ;;  %v695_v49 = vmul.f32 %v683_v29, %v676_v45 }
 0x13b   : > { %v709_v46 = vadd.f32 %v701_v41, %v690_v44  ;;  %v714_v54 = vadd.f32 %v702_v31, %v695_v49 }
 0x13d   : > { %v717_v48 = vmax.f32 %v709_v46, 0.0  ;;  %v722_v57 = vmax.f32 %v714_v54, 0.0 }
 0x13e   : > { %v647_v51 = vpop.f32.mrf.mxu3 }
 0x13f   : > { %v724_v52 = vpack.c.bf16 %v718_v47, %v717_v48  ;;  %v648_v53 = vadd.f32 %v647_v51, %v633_v50 }
 0x141   : > { %728 = vst [vmem:[%s1376_s26 + $0x8] sm:$0xff] %v724_v52  ;;  %v694_v55 = vmul.f32 %v682_v36, %v648_v53 }
 0x143   : > { %v713_v56 = vadd.f32 %v701_v41, %v694_v55 }
 0x145   : > { %v721_v58 = vmax.f32 %v713_v56, 0.0 }
 0x147   : > { %v726_v59 = vpack.c.bf16 %v722_v57, %v721_v58 }
 0x149   : > { %730 = vst [vmem:[%s1376_s26 + $0x18] sm:$0xff] %v726_v59 }
 0x14a   : > { %1218 = shalt.err (!%p1215_p8)
}
 0x14b   : > { %s1264_s20 = smov 256  }
 0x14c   : > { %1110 = dma.vmem_to_hbm [thread:$0]  (%p1323_p5), %s745_s4, 512, %s747_s5, %s732_s16, %s1264_s20, %s1264_s20, %s1263_s10  }
 0x14d PF: > { %p1122_p9 = scmp.ge.s32.totalorder %s1257_s15, 2  ;;  %s761_s24 = sand.u32 1, %s1245_s12  }
 0x14e   : > { %s762_s25 = scalar_lea.sflag [#allocation4], %s761_s24 }
 0x14f   : > { %p1117_p10 = pnand %p1122_p9, %p1327_p6 }
 0x151   : > { %p1118_p11 = pneg %p1117_p10 }
 0x153   : > { %1240 = dma.done.wait (%p1118_p11), %s762_s25, 512  }
 0x154   : > { %1242 = vsyncadd (%p1118_p11), %s762_s25, 4294966784  ;;  %p14_p12 = scmp.ge.s32.totalorder %s1310_s18, 4   ;;  %s1425_s12 = smov %s1249_s13 }
 0x155   : > { %s1426_s13 = smov %s1253_s14  ;;  %s1427_s14 = smov %s1321_s21 }
 0x156   : > { %s1428_s15 = smov %s1310_s18  ;;  %16 = sbr.rel (!%p14_p12) target bundleno = 4 (0x4), region = 73 }
 0x15b   :  { %768 = vsyncpa [#allocation3], 1 }
 0x15c   :  { %770 = vsyncpa [#allocation3 + $0x1], 1 }
 0x15d   :  { %771 = vsyncpa [#allocation4], 1 }
 0x15e   :  { %773 = vsyncpa [#allocation4 + $0x1], 1 }

</bundles_post_ra>
